<compile_context>
chip_gen: v7x
topology: tpu7x:2x2x1
jax: 0.10.0
libtpu: 0.0.40
codegen_flags: <defaults>
</compile_context>

<pallas_src>
import jax
import jax.numpy as jnp
from jax import lax
from jax.experimental import pallas as pl
from jax.experimental.pallas import tpu as pltpu


def _cat_view_kernel(x_smem, o_ref):
    """Fused cat([x, x], dim=1).view(3, -1), single full-tile store.

    Output position (r, c) is flat index k = r*4 + c of the flattened cat
    result; source element x[i, j] lands at k in {6*i + j, 6*i + j + 3}:
      row 0: [x00, x01, x02, x00]
      row 1: [x01, x02, x10, x11]
      row 2: [x12, x10, x11, x12]
    The tile is built with VPU compares/selects on an iota (scalar SMEM
    reads broadcast to vregs) and written once -- no masked partial stores,
    no XLU lane shifts.
    """
    r = lax.broadcasted_iota(jnp.int32, (3, 4), 0)
    c = lax.broadcasted_iota(jnp.int32, (3, 4), 1)
    k = r * 4 + c

    val = jnp.zeros((3, 4), dtype=o_ref.dtype)
    for i in range(2):          # static Python loop -> fully unrolled selects
        for j in range(3):
            a = 6 * i + j
            mask = (k == a) | (k == a + 3)
            val = jnp.where(mask, x_smem[i, j], val)

    o_ref[...] = val            # single store of the whole (3, 4) tile


def model_forward(x):
    """x: (2, 3) float32 -> (3, 4) float32 (same as the PyTorch forward)."""
    assert x.shape == (2, 3), "forward is only well-defined for a (2, 3) input"
    return pl.pallas_call(
        _cat_view_kernel,
        out_shape=jax.ShapeDtypeStruct((3, 4), x.dtype),
        in_specs=[pl.BlockSpec(memory_space=pltpu.MemorySpace.SMEM)],
        out_specs=pl.BlockSpec(memory_space=pltpu.MemorySpace.VMEM),
    )(x)


if __name__ == "__main__":
    key = jax.random.PRNGKey(0)
    x = jax.random.normal(key, (2, 3), dtype=jnp.float32)

    out = model_forward(x)
    out = jax.block_until_ready(out)

    # Pure-JAX reference (y == x for a (2,3) input).
    ref = jnp.concatenate([x, x], axis=1).reshape(3, 4)
    assert out.shape == (3, 4) and out.dtype == jnp.float32
    assert jnp.allclose(out, ref), "Pallas output mismatch vs JAX reference"

    print("KERNEL_OK")
</pallas_src>

<mosaic_0001>
module attributes {stable_mosaic.version = 11 : i64} {
  func.func @_cat_view_kernel(%arg0: memref<2x3xf32, #tpu.memory_space<smem>>, %arg1: memref<3x4xf32, #tpu.memory_space<vmem>>) attributes {dimension_semantics = [], scalar_prefetch = 0 : i64, scratch_operands = 0 : i64, tpu.core_type = #tpu.core_type<tc>} {
    %0 = tpu.iota {dimensions = array<i32: 0>} : vector<3x4xi32>
    %1 = tpu.iota {dimensions = array<i32: 1>} : vector<3x4xi32>
    %c4_i32 = arith.constant 4 : i32
    %2 = vector.broadcast %c4_i32 : i32 to vector<3x4xi32>
    %3 = arith.muli %0, %2 : vector<3x4xi32>
    %4 = arith.addi %3, %1 : vector<3x4xi32>
    %cst = arith.constant 0.000000e+00 : f32
    %5 = vector.broadcast %cst : f32 to vector<3x4xf32>
    %c0_i32 = arith.constant 0 : i32
    %6 = vector.broadcast %c0_i32 : i32 to vector<3x4xi32>
    %7 = arith.cmpi eq, %4, %6 : vector<3x4xi32>
    %c3_i32 = arith.constant 3 : i32
    %8 = vector.broadcast %c3_i32 : i32 to vector<3x4xi32>
    %9 = arith.cmpi eq, %4, %8 : vector<3x4xi32>
    %10 = arith.ori %7, %9 : vector<3x4xi1>
    %c0 = arith.constant 0 : index
    %c0_0 = arith.constant 0 : index
    %11 = memref.load %arg0[%c0, %c0_0] : memref<2x3xf32, #tpu.memory_space<smem>>
    %12 = vector.broadcast %11 : f32 to vector<3x4xf32>
    %13 = arith.select %10, %12, %5 : vector<3x4xi1>, vector<3x4xf32>
    %c1_i32 = arith.constant 1 : i32
    %14 = vector.broadcast %c1_i32 : i32 to vector<3x4xi32>
    %15 = arith.cmpi eq, %4, %14 : vector<3x4xi32>
    %c4_i32_1 = arith.constant 4 : i32
    %16 = vector.broadcast %c4_i32_1 : i32 to vector<3x4xi32>
    %17 = arith.cmpi eq, %4, %16 : vector<3x4xi32>
    %18 = arith.ori %15, %17 : vector<3x4xi1>
    %c0_2 = arith.constant 0 : index
    %c1 = arith.constant 1 : index
    %19 = memref.load %arg0[%c0_2, %c1] : memref<2x3xf32, #tpu.memory_space<smem>>
    %20 = vector.broadcast %19 : f32 to vector<3x4xf32>
    %21 = arith.select %18, %20, %13 : vector<3x4xi1>, vector<3x4xf32>
    %c2_i32 = arith.constant 2 : i32
    %22 = vector.broadcast %c2_i32 : i32 to vector<3x4xi32>
    %23 = arith.cmpi eq, %4, %22 : vector<3x4xi32>
    %c5_i32 = arith.constant 5 : i32
    %24 = vector.broadcast %c5_i32 : i32 to vector<3x4xi32>
    %25 = arith.cmpi eq, %4, %24 : vector<3x4xi32>
    %26 = arith.ori %23, %25 : vector<3x4xi1>
    %c0_3 = arith.constant 0 : index
    %c2 = arith.constant 2 : index
    %27 = memref.load %arg0[%c0_3, %c2] : memref<2x3xf32, #tpu.memory_space<smem>>
    %28 = vector.broadcast %27 : f32 to vector<3x4xf32>
    %29 = arith.select %26, %28, %21 : vector<3x4xi1>, vector<3x4xf32>
    %c6_i32 = arith.constant 6 : i32
    %30 = vector.broadcast %c6_i32 : i32 to vector<3x4xi32>
    %31 = arith.cmpi eq, %4, %30 : vector<3x4xi32>
    %c9_i32 = arith.constant 9 : i32
    %32 = vector.broadcast %c9_i32 : i32 to vector<3x4xi32>
    %33 = arith.cmpi eq, %4, %32 : vector<3x4xi32>
    %34 = arith.ori %31, %33 : vector<3x4xi1>
    %c1_4 = arith.constant 1 : index
    %c0_5 = arith.constant 0 : index
    %35 = memref.load %arg0[%c1_4, %c0_5] : memref<2x3xf32, #tpu.memory_space<smem>>
    %36 = vector.broadcast %35 : f32 to vector<3x4xf32>
    %37 = arith.select %34, %36, %29 : vector<3x4xi1>, vector<3x4xf32>
    %c7_i32 = arith.constant 7 : i32
    %38 = vector.broadcast %c7_i32 : i32 to vector<3x4xi32>
    %39 = arith.cmpi eq, %4, %38 : vector<3x4xi32>
    %c10_i32 = arith.constant 10 : i32
    %40 = vector.broadcast %c10_i32 : i32 to vector<3x4xi32>
    %41 = arith.cmpi eq, %4, %40 : vector<3x4xi32>
    %42 = arith.ori %39, %41 : vector<3x4xi1>
    %c1_6 = arith.constant 1 : index
    %c1_7 = arith.constant 1 : index
    %43 = memref.load %arg0[%c1_6, %c1_7] : memref<2x3xf32, #tpu.memory_space<smem>>
    %44 = vector.broadcast %43 : f32 to vector<3x4xf32>
    %45 = arith.select %42, %44, %37 : vector<3x4xi1>, vector<3x4xf32>
    %c8_i32 = arith.constant 8 : i32
    %46 = vector.broadcast %c8_i32 : i32 to vector<3x4xi32>
    %47 = arith.cmpi eq, %4, %46 : vector<3x4xi32>
    %c11_i32 = arith.constant 11 : i32
    %48 = vector.broadcast %c11_i32 : i32 to vector<3x4xi32>
    %49 = arith.cmpi eq, %4, %48 : vector<3x4xi32>
    %50 = arith.ori %47, %49 : vector<3x4xi1>
    %c1_8 = arith.constant 1 : index
    %c2_9 = arith.constant 2 : index
    %51 = memref.load %arg0[%c1_8, %c2_9] : memref<2x3xf32, #tpu.memory_space<smem>>
    %52 = vector.broadcast %51 : f32 to vector<3x4xf32>
    %53 = arith.select %50, %52, %45 : vector<3x4xi1>, vector<3x4xf32>
    %c0_10 = arith.constant 0 : index
    %c0_11 = arith.constant 0 : index
    %54 = vector.load %arg1[%c0_10, %c0_11] : memref<3x4xf32, #tpu.memory_space<vmem>>, vector<3x4xf32>
    tpu.vector_store %arg1[%c0_10, %c0_11], %53 {strides = array<i32>} : memref<3x4xf32, #tpu.memory_space<vmem>>, vector<3x4xf32>,
    return
  }
}

</mosaic_0001>

<bundles_post_ra>
// kernel: tpu_custom_call.1
= control target key start
LH: loop header
LB: loop body
LE: loop exit
PB: predicated region body
PF: predicated region fallthrough
CT: control target
= control target key end

     0   :  { %6 = vsyncpa [#allocation4], 0  ;;  %s171_s0 = inlined_call_operand.hbm [shape: f32[2,3], index: 0, kind: input, shape index: {}]   ;;  %s172_s1 = inlined_call_operand.hbm [shape: f32[3,4], index: 1, kind: output, shape index: {}]  }
   0x1   :  { %7 = vsyncpa [#allocation3], 0  ;;  %s86_s8 = scalar_lea.hbm %s171_s0, 32 }
   0x2   :  { %p87_p0 = scmp.ne.s32.totalorder %s171_s0, %s86_s8  ;;  %p90_p1 = scmp.lt.u32.totalorder %s86_s8, %s171_s0 }
   0x4   :  { %p92_p2 = pnand %p90_p1, %p87_p0 }
   0x6   :  { %95 = shalt.err (!%p92_p2)
}
   0x7   :  { %s122_s13 = smov [#allocation2]  }
   0x8   :  { %15 = dma.hbm_to_smem %s171_s0, 32, %s122_s13, [#allocation4]  }
   0x9   :  { %118 = dma.done.wait [#allocation4], 32  }
   0xa   :  { %119 = vsyncadd [#allocation4], 4294967264 }
   0xb   :  { %19 = sfence }
   0xc   :  { %v20_v0 = vlaneseq  ;;  %s29_s16 = sld [smem:[#allocation2]]  ;;  %s79_s17 = sld [smem:[#allocation2 + $0x1]] }
   0xd   :  { %s146_s18 = sld [smem:[#allocation2 + $0x2]]  ;;  %s148_s19 = sld [smem:[#allocation2 + $0x80]] }
   0xe   :  { %v21_v1 = vshrl.u32 %v20_v0, 7  ;;  %v23_v2 = vand.u32 127, %v20_v0  ;;  %s150_s20 = sld [smem:[#allocation2 + $0x81]]  ;;  %s152_s21 = sld [smem:[#allocation2 + $0x82]] }
   0xf   :  { %s123_s0 = smov [#allocation5]  }
  0x10   :  { %v24_v3 = vmul.u32 4, %v21_v1  ;;  %s70_s22 = sshll.u32 %s123_s0, 4  ;;  %s71_s22 = int_to_ptr.vmem [resolvable:$true] %s70_s22 }
  0x11   :  { %s96_s23 = scalar_lea.vmem %s71_s22, 64  ;;  %p101_p4 = scmp.lt.s32.totalorder %s71_s22, %s71_s22 }
  0x12   :  { %v25_v4 = vadd.s32 %v24_v3, %v23_v2  ;;  %v30_v5 = vstv %s29_s16  ;;  %v36_v6 = vstv %s79_s17  ;;  %p97_p3 = scmp.ne.s32.totalorder %s71_s22, %s96_s23  ;;  %p102_p5 = scmp.lt.s32.totalorder %s96_s23, %s96_s23 }
  0x13   :  { %v42_v7 = vstv %s146_s18  ;;  %v48_v9 = vstv %s148_s19 }
  0x14   :  { %vm26_vm0 = vcmp.eq.s32.totalorder %v25_v4, 0  ;;  %vm27_vm1 = vcmp.eq.s32.totalorder %v25_v4, 3  ;;  %vm32_vm2 = vcmp.eq.s32.totalorder %v25_v4, 1  ;;  %vm33_vm3 = vcmp.eq.s32.totalorder %v25_v4, 4  ;;  %p103_p6 = por %p102_p5, %p101_p4 }
  0x15   :  { %vm28_vm4 = vmor %vm26_vm0, %vm27_vm1  ;;  %vm38_vm5 = vcmp.eq.s32.totalorder %v25_v4, 2  ;;  %vm39_vm6 = vcmp.eq.s32.totalorder %v25_v4, 5  ;;  %vm44_vm7 = vcmp.eq.s32.totalorder %v25_v4, 6  ;;  %vm45_vm8 = vcmp.eq.s32.totalorder %v25_v4, 9 }
  0x16   :  { %v31_v8 = vsel %vm28_vm4, %v30_v5, 0.0  ;;  %vm34_vm9 = vmor %vm32_vm2, %vm33_vm3  ;;  %vm50_vm10 = vcmp.eq.s32.totalorder %v25_v4, 7  ;;  %vm51_vm11 = vcmp.eq.s32.totalorder %v25_v4, 10  ;;  %v54_v11 = vstv %s150_s20  ;;  %p104_p7 = pnand %p103_p6, %p97_p3 }
  0x17   :  { %v37_v10 = vsel %vm34_vm9, %v36_v6, %v31_v8  ;;  %vm40_vm12 = vmor %vm38_vm5, %vm39_vm6  ;;  %vm56_vm13 = vcmp.eq.s32.totalorder %v25_v4, 8  ;;  %vm57_vm14 = vcmp.eq.s32.totalorder %v25_v4, 11  ;;  %v60_v13 = vstv %s152_s21 }
  0x18   :  { %v43_v12 = vsel %vm40_vm12, %v42_v7, %v37_v10  ;;  %vm46_vm15 = vmor %vm44_vm7, %vm45_vm8  ;;  %vm62_vm1 = vcmask 26624  }
  0x19   :  { %v49_v14 = vsel %vm46_vm15, %v48_v9, %v43_v12  ;;  %vm52_vm0 = vmor %vm50_vm10, %vm51_vm11 }
  0x1a   :  { %v55_v15 = vsel %vm52_vm0, %v54_v11, %v49_v14  ;;  %vm58_vm4 = vmor %vm56_vm13, %vm57_vm14 }
  0x1b   :  { %v61_v16 = vsel %vm58_vm4, %v60_v13, %v55_v15 }
  0x1c   :  { %63 = vst.msk [vmem:[#allocation5] sm:$0x7] %vm62_vm1, %v61_v16 }
  0x1d   :  { %107 = shalt.err (!%p104_p7)
}
  0x1e   :  { %s108_s26 = scalar_lea.hbm %s172_s1, 64 }
  0x1f   :  { %p109_p8 = scmp.ne.s32.totalorder %s172_s1, %s108_s26  ;;  %p112_p9 = scmp.lt.u32.totalorder %s108_s26, %s172_s1 }
  0x21   :  { %p114_p10 = pnand %p112_p9, %p109_p8 }
  0x23   :  { %117 = shalt.err (!%p114_p10)
}
  0x24   :  { %73 = dma.vmem_to_hbm [thread:$0]  %s71_s22, 64, %s172_s1, [#allocation3]  }
  0x25   :  { %120 = dma.done.wait [#allocation3], 64  }
  0x26   :  { %121 = vsyncadd [#allocation3], 4294967232 }
  0x27   :  { %77 = vsyncpa [#allocation3], 1 }
  0x28   :  { %78 = vsyncpa [#allocation4], 1 }

</bundles_post_ra>
